<compile_context>
chip_gen: v6e
topology: v6e:2x2x1
jax: 0.10.0
libtpu: 0.0.40
codegen_flags: <defaults>
</compile_context>

<pallas_src>
import functools
import math

import jax
import jax.numpy as jnp
from jax.experimental import pallas as pl
from jax.experimental.pallas import tpu as pltpu


def _layernorm_f32(x, gamma, beta, eps=1e-5):
    """LayerNorm in f32 with single-pass variance (E[x^2] - mean^2)."""
    mean = jnp.mean(x, axis=-1, keepdims=True)
    ex2 = jnp.mean(x * x, axis=-1, keepdims=True)
    var = jnp.maximum(ex2 - mean * mean, 0.0)
    xhat = (x - mean) * jax.lax.rsqrt(var + eps)
    return xhat * gamma.astype(jnp.float32) + beta.astype(jnp.float32)


# ---------------------------------------------------------------------------
# Kernel 1: per-batch attention block     y = x + proj(attn(norm1(x)))
# ---------------------------------------------------------------------------
def attention_block_kernel(x_ref, g1_ref, be1_ref, wqkv_ref, bqkv_ref,
                           wproj_ref, bproj_ref, o_ref, *, num_heads, scale):
    w_dtype = wqkv_ref.dtype          # MXU compute dtype (bf16 fast path)
    x = x_ref[0].astype(jnp.float32)  # (N, C) — VPU/EUP math stays in f32
    N, C = x.shape
    H = num_heads
    D = C // H

    xn = _layernorm_f32(x, g1_ref[0], be1_ref[0])

    # QKV projection: low-precision MXU inputs, f32 accumulation.
    qkv = jnp.dot(xn.astype(w_dtype), wqkv_ref[...],
                  preferred_element_type=jnp.float32)
    qkv = qkv + bqkv_ref[0].astype(jnp.float32)               # (N, 3C)

    # Fold 1/sqrt(D) into q: an (N, C) multiply instead of (H, N, N).
    q = (qkv[:, 0 * C:1 * C] * scale).reshape(N, H, D)
    k = qkv[:, 1 * C:2 * C].reshape(N, H, D)
    v = qkv[:, 2 * C:3 * C].reshape(N, H, D)

    # Head-batched score / context matmuls (no explicit head transposes).
    s = jnp.einsum('nhd,mhd->hnm', q.astype(w_dtype), k.astype(w_dtype),
                   preferred_element_type=jnp.float32)        # (H, N, N)
    s = s - jnp.max(s, axis=-1, keepdims=True)
    p = jnp.exp(s)
    # EUP approximate reciprocal instead of a VPU divide.
    p = p * pl.reciprocal(jnp.sum(p, axis=-1, keepdims=True), approx=True)
    # TODO(synk): attn_drop (p=0.1) is identity in inference/eval mode.

    ctx = jnp.einsum('hnm,mhd->nhd', p.astype(w_dtype), v.astype(w_dtype),
                     preferred_element_type=jnp.float32)      # (N, H, D)

    # Output projection kept as a single K=C GEMM (full contraction width on
    # the MXU — better than folding per-head where K would only be D wide).
    attn_out = jnp.dot(ctx.reshape(N, C).astype(w_dtype), wproj_ref[...],
                       preferred_element_type=jnp.float32)
    attn_out = attn_out + bproj_ref[0].astype(jnp.float32)

    o_ref[0] = (x + attn_out).astype(o_ref.dtype)


# ---------------------------------------------------------------------------
# Kernel 2: row-tiled MLP block           out = y + fc2(gelu(fc1(norm2(y))))
# ---------------------------------------------------------------------------
def mlp_block_kernel(y_ref, g2_ref, be2_ref, w1_ref, b1_ref, w2_ref, b2_ref,
                     o_ref):
    w_dtype = w1_ref.dtype
    y = y_ref[...].astype(jnp.float32)            # (tr, C)

    xn = _layernorm_f32(y, g2_ref[0], be2_ref[0])

    h = jnp.dot(xn.astype(w_dtype), w1_ref[...],
                preferred_element_type=jnp.float32)
    h = h + b1_ref[0].astype(jnp.float32)
    # Exact (erf) GELU to match nn.GELU() default semantics.  approximate=True
    # (tanh, EUP) would be faster but changes numerics vs. the PyTorch spec.
    h = jax.nn.gelu(h, approximate=False)

    mlp_out = jnp.dot(h.astype(w_dtype), w2_ref[...],
                      preferred_element_type=jnp.float32)
    mlp_out = mlp_out + b2_ref[0].astype(jnp.float32)
    # TODO(synk): MLP Dropout (p=0.1) is identity in inference/eval mode.

    o_ref[...] = (y + mlp_out).astype(o_ref.dtype)


def _pick_row_tile(total_rows, target=256):
    """Largest row tile <= target keeping the (8, 128) sublane rule happy."""
    if total_rows <= target:
        return total_rows
    best = 8
    for t in range(8, target + 1, 8):
        if total_rows % t == 0:
            best = t
    return best


def transformer_encoder_layer(x, params, num_heads, *, row_tile=256,
                              vmem_limit_bytes=32 * 1024 * 1024):
    B, N, C = x.shape
    H = num_heads
    D = C // H
    hidden = params["w1"].shape[1]
    scale = 1.0 / math.sqrt(D)
    itemsize = x.dtype.itemsize

    # Weights whose index_map never changes are only DMA'd once; at ViT scale,
    # keep them in bf16 and raise vmem_limit_bytes as needed.
    full2 = lambda shape: pl.BlockSpec(shape, lambda i: (0, 0))

    compiler_params = pltpu.CompilerParams(
        dimension_semantics=("parallel",),
        vmem_limit_bytes=vmem_limit_bytes)

    # ---------------- attention block (per batch) ----------------
    attn_flops = B * (2 * N * C * 3 * C + 4 * H * N * N * D + 2 * N * C * C)
    attn_bytes = (2 * B * N * C + C * 3 * C + C * C) * itemsize
    y = pl.pallas_call(
        functools.partial(attention_block_kernel, num_heads=num_heads,
                          scale=scale),
        out_shape=jax.ShapeDtypeStruct((B, N, C), x.dtype),
        grid_spec=pltpu.PrefetchScalarGridSpec(
            num_scalar_prefetch=0,
            grid=(B,),
            in_specs=[
                pl.BlockSpec((1, N, C), lambda b: (b, 0, 0)),  # x
                full2((1, C)),                                  # norm1 gamma
                full2((1, C)),                                  # norm1 beta
                full2((C, 3 * C)),                              # qkv weight (T)
                full2((1, 3 * C)),                              # qkv bias
                full2((C, C)),                                  # proj weight (T)
                full2((1, C)),                                  # proj bias
            ],
            out_specs=pl.BlockSpec((1, N, C), lambda b: (b, 0, 0)),
        ),
        compiler_params=compiler_params,
        cost_estimate=pl.CostEstimate(
            flops=attn_flops,
            transcendentals=B * H * N * N,
            bytes_accessed=attn_bytes),
    )(x, params["g1"], params["be1"], params["wqkv"], params["bqkv"],
      params["wproj"], params["bproj"])

    # ---------------- MLP block (row-tiled over B*N) ----------------
    rows = B * N
    tr = _pick_row_tile(rows, row_tile)
    y2 = y.reshape(rows, C)

    mlp_flops = 4 * rows * C * hidden
    mlp_bytes = (2 * rows * C + 2 * C * hidden) * itemsize
    out2 = pl.pallas_call(
        mlp_block_kernel,
        out_shape=jax.ShapeDtypeStruct((rows, C), x.dtype),
        grid_spec=pltpu.PrefetchScalarGridSpec(
            num_scalar_prefetch=0,
            grid=(pl.cdiv(rows, tr),),
            in_specs=[
                pl.BlockSpec((tr, C), lambda i: (i, 0)),        # y rows
                full2((1, C)),                                  # norm2 gamma
                full2((1, C)),                                  # norm2 beta
                full2((C, hidden)),                             # fc1 weight (T)
                full2((1, hidden)),                             # fc1 bias
                full2((hidden, C)),                             # fc2 weight (T)
                full2((1, C)),                                  # fc2 bias
            ],
            out_specs=pl.BlockSpec((tr, C), lambda i: (i, 0)),
        ),
        compiler_params=compiler_params,
        cost_estimate=pl.CostEstimate(
            flops=mlp_flops,
            transcendentals=rows * hidden,
            bytes_accessed=mlp_bytes),
    )(y2, params["g2"], params["be2"], params["w1"], params["b1"],
      params["w2"], params["b2"])

    return out2.reshape(B, N, C)


def reference_forward(x, params, num_heads):
    """Pure-JAX reference mirroring the PyTorch forward (eval mode)."""
    B, N, C = x.shape
    D = C // num_heads

    def ln(v, g, b):
        m = jnp.mean(v, -1, keepdims=True)
        var = jnp.mean((v - m) ** 2, -1, keepdims=True)
        return (v - m) * jax.lax.rsqrt(var + 1e-5) * g + b

    xn = ln(x, params["g1"][0], params["be1"][0])
    qkv = xn @ params["wqkv"] + params["bqkv"][0]
    q, k, v = jnp.split(qkv, 3, axis=-1)
    q = q.reshape(B, N, num_heads, D).transpose(0, 2, 1, 3)
    k = k.reshape(B, N, num_heads, D).transpose(0, 2, 1, 3)
    v = v.reshape(B, N, num_heads, D).transpose(0, 2, 1, 3)
    attn = jax.nn.softmax(q @ k.transpose(0, 1, 3, 2) / math.sqrt(D), axis=-1)
    out = (attn @ v).transpose(0, 2, 1, 3).reshape(B, N, C)
    x = x + out @ params["wproj"] + params["bproj"][0]

    xn2 = ln(x, params["g2"][0], params["be2"][0])
    h = jax.nn.gelu(xn2 @ params["w1"] + params["b1"][0], approximate=False)
    return x + h @ params["w2"] + params["b2"][0]


if __name__ == "__main__":
    B, N, C = 2, 8, 32
    num_heads = 4
    hidden = int(C * 4.0)

    keys = jax.random.split(jax.random.PRNGKey(0), 9)
    w_scale = 0.05
    params = {
        "g1": jnp.ones((1, C), jnp.float32),
        "be1": jnp.zeros((1, C), jnp.float32),
        "g2": jnp.ones((1, C), jnp.float32),
        "be2": jnp.zeros((1, C), jnp.float32),
        "wqkv": w_scale * jax.random.normal(keys[0], (C, 3 * C), jnp.float32),
        "bqkv": w_scale * jax.random.normal(keys[1], (1, 3 * C), jnp.float32),
        "wproj": w_scale * jax.random.normal(keys[2], (C, C), jnp.float32),
        "bproj": w_scale * jax.random.normal(keys[3], (1, C), jnp.float32),
        "w1": w_scale * jax.random.normal(keys[4], (C, hidden), jnp.float32),
        "b1": w_scale * jax.random.normal(keys[5], (1, hidden), jnp.float32),
        "w2": w_scale * jax.random.normal(keys[6], (hidden, C), jnp.float32),
        "b2": w_scale * jax.random.normal(keys[7], (1, C), jnp.float32),
    }
    x = jax.random.normal(keys[8], (B, N, C), jnp.float32)

    ref = reference_forward(x, params, num_heads)

    # f32 path: tight correctness check vs the pure-JAX reference.
    out = jax.block_until_ready(transformer_encoder_layer(x, params, num_heads))
    assert out.shape == (B, N, C)
    assert jnp.allclose(out, ref, atol=2e-3, rtol=2e-3), "f32 mismatch vs reference"

    # bf16 fast path: bf16 weights/activations into the MXU, f32 accumulation.
    params_bf16 = jax.tree_util.tree_map(
        lambda a: a.astype(jnp.bfloat16), params)
    x_bf16 = x.astype(jnp.bfloat16)
    out_bf16 = jax.block_until_ready(
        transformer_encoder_layer(x_bf16, params_bf16, num_heads))
    assert out_bf16.shape == (B, N, C)
    assert jnp.allclose(out_bf16.astype(jnp.float32), ref, atol=1e-1, rtol=1e-1), \
        "bf16 mismatch vs reference"

    print("KERNEL_OK")
</pallas_src>

<mosaic_0001>
module attributes {stable_mosaic.version = 11 : i64} {
  func.func @attention_block_kernel(%arg0: i32, %arg1: memref<1x8x32xf32, #tpu.memory_space<vmem>>, %arg2: memref<1x32xf32, #tpu.memory_space<vmem>>, %arg3: memref<1x32xf32, #tpu.memory_space<vmem>>, %arg4: memref<32x96xf32, #tpu.memory_space<vmem>>, %arg5: memref<1x96xf32, #tpu.memory_space<vmem>>, %arg6: memref<32x32xf32, #tpu.memory_space<vmem>>, %arg7: memref<1x32xf32, #tpu.memory_space<vmem>>, %arg8: memref<1x8x32xf32, #tpu.memory_space<vmem>>) attributes {dimension_semantics = [#tpu.dimension_semantics<parallel>], iteration_bounds = array<i64: 2>, scalar_prefetch = 0 : i64, scratch_operands = 0 : i64, tpu.core_type = #tpu.core_type<tc>, window_params = [{transform_indices = @transform_0, window_bounds = array<i64: 1, 8, 32>}, {pipeline_mode = #tpu.pipeline_mode<synchronous>, transform_indices = @transform_1, window_bounds = array<i64: 1, 32>}, {pipeline_mode = #tpu.pipeline_mode<synchronous>, transform_indices = @transform_2, window_bounds = array<i64: 1, 32>}, {pipeline_mode = #tpu.pipeline_mode<synchronous>, transform_indices = @transform_3, window_bounds = array<i64: 32, 96>}, {pipeline_mode = #tpu.pipeline_mode<synchronous>, transform_indices = @transform_4, window_bounds = array<i64: 1, 96>}, {pipeline_mode = #tpu.pipeline_mode<synchronous>, transform_indices = @transform_5, window_bounds = array<i64: 32, 32>}, {pipeline_mode = #tpu.pipeline_mode<synchronous>, transform_indices = @transform_6, window_bounds = array<i64: 1, 32>}, {transform_indices = @transform_7, window_bounds = array<i64: 1, 8, 32>}]} {
    %c0 = arith.constant 0 : index
    %c0_0 = arith.constant 0 : index
    %c0_1 = arith.constant 0 : index
    %0 = vector.load %arg1[%c0, %c0_0, %c0_1] : memref<1x8x32xf32, #tpu.memory_space<vmem>>, vector<1x8x32xf32>
    %1 = vector.shape_cast %0 : vector<1x8x32xf32> to vector<8x32xf32>
    %c0_2 = arith.constant 0 : index
    %c0_3 = arith.constant 0 : index
    %2 = vector.load %arg2[%c0_2, %c0_3] : memref<1x32xf32, #tpu.memory_space<vmem>>, vector<1x32xf32>
    %3 = vector.shape_cast %2 : vector<1x32xf32> to vector<32xf32>
    %c0_4 = arith.constant 0 : index
    %c0_5 = arith.constant 0 : index
    %4 = vector.load %arg3[%c0_4, %c0_5] : memref<1x32xf32, #tpu.memory_space<vmem>>, vector<1x32xf32>
    %5 = vector.shape_cast %4 : vector<1x32xf32> to vector<32xf32>
    %cst = arith.constant dense<0.000000e+00> : vector<8xf32>
    %6 = vector.multi_reduction <add>, %1, %cst [1] : vector<8x32xf32> to vector<8xf32>
    %7 = vector.shape_cast %6 : vector<8xf32> to vector<8x1xf32>
    %cst_6 = arith.constant 3.200000e+01 : f32
    %8 = vector.broadcast %cst_6 : f32 to vector<8x1xf32>
    %9 = arith.divf %7, %8 : vector<8x1xf32>
    %10 = arith.mulf %1, %1 : vector<8x32xf32>
    %cst_7 = arith.constant dense<0.000000e+00> : vector<8xf32>
    %11 = vector.multi_reduction <add>, %10, %cst_7 [1] : vector<8x32xf32> to vector<8xf32>
    %12 = vector.shape_cast %11 : vector<8xf32> to vector<8x1xf32>
    %cst_8 = arith.constant 3.200000e+01 : f32
    %13 = vector.broadcast %cst_8 : f32 to vector<8x1xf32>
    %14 = arith.divf %12, %13 : vector<8x1xf32>
    %15 = arith.mulf %9, %9 : vector<8x1xf32>
    %16 = arith.subf %14, %15 : vector<8x1xf32>
    %cst_9 = arith.constant 0.000000e+00 : f32
    %17 = vector.broadcast %cst_9 : f32 to vector<8x1xf32>
    %18 = arith.maximumf %16, %17 : vector<8x1xf32>
    %19 = vector.broadcast %9 : vector<8x1xf32> to vector<8x32xf32>
    %20 = arith.subf %1, %19 : vector<8x32xf32>
    %cst_10 = arith.constant 9.99999974E-6 : f32
    %21 = vector.broadcast %cst_10 : f32 to vector<8x1xf32>
    %22 = arith.addf %18, %21 : vector<8x1xf32>
    %23 = math.rsqrt %22 : vector<8x1xf32>
    %24 = vector.broadcast %23 : vector<8x1xf32> to vector<8x32xf32>
    %25 = arith.mulf %20, %24 : vector<8x32xf32>
    %26 = vector.shape_cast %3 : vector<32xf32> to vector<1x32xf32>
    %27 = vector.broadcast %26 : vector<1x32xf32> to vector<8x32xf32>
    %28 = arith.mulf %25, %27 : vector<8x32xf32>
    %29 = vector.shape_cast %5 : vector<32xf32> to vector<1x32xf32>
    %30 = vector.broadcast %29 : vector<1x32xf32> to vector<8x32xf32>
    %31 = arith.addf %28, %30 : vector<8x32xf32>
    %c0_11 = arith.constant 0 : index
    %c0_12 = arith.constant 0 : index
    %32 = vector.load %arg4[%c0_11, %c0_12] : memref<32x96xf32, #tpu.memory_space<vmem>>, vector<32x96xf32>
    %cst_13 = arith.constant dense<0.000000e+00> : vector<8x96xf32>
    %33 = tpu.matmul %31, %32, %cst_13 {dimension_numbers = #tpu.dot_dimension_numbers<[1], [0], [0], [1], [0, 0, 1, 1], [], []>} : vector<8x32xf32>, vector<32x96xf32>, vector<8x96xf32> -> vector<8x96xf32>
    %c0_14 = arith.constant 0 : index
    %c0_15 = arith.constant 0 : index
    %34 = vector.load %arg5[%c0_14, %c0_15] : memref<1x96xf32, #tpu.memory_space<vmem>>, vector<1x96xf32>
    %35 = vector.shape_cast %34 : vector<1x96xf32> to vector<96xf32>
    %36 = vector.shape_cast %35 : vector<96xf32> to vector<1x96xf32>
    %37 = vector.broadcast %36 : vector<1x96xf32> to vector<8x96xf32>
    %38 = arith.addf %33, %37 : vector<8x96xf32>
    %39 = vector.extract_strided_slice %38 {offsets = [0, 0], sizes = [8, 32], strides = [1, 1]} : vector<8x96xf32> to vector<8x32xf32>
    %cst_16 = arith.constant 0.353553385 : f32
    %40 = vector.broadcast %cst_16 : f32 to vector<8x32xf32>
    %41 = arith.mulf %39, %40 : vector<8x32xf32>
    %42 = vector.shape_cast %41 : vector<8x32xf32> to vector<8x4x8xf32>
    %43 = vector.extract_strided_slice %38 {offsets = [0, 32], sizes = [8, 32], strides = [1, 1]} : vector<8x96xf32> to vector<8x32xf32>
    %44 = vector.shape_cast %43 : vector<8x32xf32> to vector<8x4x8xf32>
    %45 = vector.extract_strided_slice %38 {offsets = [0, 64], sizes = [8, 32], strides = [1, 1]} : vector<8x96xf32> to vector<8x32xf32>
    %46 = vector.shape_cast %45 : vector<8x32xf32> to vector<8x4x8xf32>
    "tpu.trace_start"() <{level = 10 : i32, message = "nhd,mhd->hnm"}> : () -> ()
    %cst_17 = arith.constant dense<0.000000e+00> : vector<4x8x8xf32>
    %47 = tpu.matmul %42, %44, %cst_17 {dimension_numbers = #tpu.dot_dimension_numbers<[2], [2], [0], [0], [0, 1, 0, 0, 1, 0], [1], [1]>} : vector<8x4x8xf32>, vector<8x4x8xf32>, vector<4x8x8xf32> -> vector<4x8x8xf32>
    "tpu.trace_stop"() : () -> ()
    %cst_18 = arith.constant dense<0xFF800000> : vector<4x8xf32>
    %48 = vector.multi_reduction <maximumf>, %47, %cst_18 [2] : vector<4x8x8xf32> to vector<4x8xf32>
    %49 = vector.shape_cast %48 : vector<4x8xf32> to vector<4x8x1xf32>
    %50 = vector.broadcast %49 : vector<4x8x1xf32> to vector<4x8x8xf32>
    %51 = arith.subf %47, %50 : vector<4x8x8xf32>
    %52 = math.exp %51 : vector<4x8x8xf32>
    %cst_19 = arith.constant dense<0.000000e+00> : vector<4x8xf32>
    %53 = vector.multi_reduction <add>, %52, %cst_19 [2] : vector<4x8x8xf32> to vector<4x8xf32>
    %54 = vector.shape_cast %53 : vector<4x8xf32> to vector<4x8x1xf32>
    %55 = tpu.reciprocal %54 {approx = true} : vector<4x8x1xf32> -> vector<4x8x1xf32>
    %56 = vector.broadcast %55 : vector<4x8x1xf32> to vector<4x8x8xf32>
    %57 = arith.mulf %52, %56 : vector<4x8x8xf32>
    "tpu.trace_start"() <{level = 10 : i32, message = "hnm,mhd->nhd"}> : () -> ()
    %cst_20 = arith.constant dense<0.000000e+00> : vector<4x8x8xf32>
    %58 = tpu.matmul %46, %57, %cst_20 {dimension_numbers = #tpu.dot_dimension_numbers<[0], [2], [2], [1], [0, 1, 0, 2, 1, 1], [1], [0]>} : vector<8x4x8xf32>, vector<4x8x8xf32>, vector<4x8x8xf32> -> vector<4x8x8xf32>
    %59 = tpu.transpose %58, [2, 0, 1] : vector<4x8x8xf32> -> vector<8x4x8xf32>
    "tpu.trace_stop"() : () -> ()
    %60 = vector.shape_cast %59 : vector<8x4x8xf32> to vector<8x32xf32>
    %c0_21 = arith.constant 0 : index
    %c0_22 = arith.constant 0 : index
    %61 = vector.load %arg6[%c0_21, %c0_22] : memref<32x32xf32, #tpu.memory_space<vmem>>, vector<32x32xf32>
    %cst_23 = arith.constant dense<0.000000e+00> : vector<8x32xf32>
    %62 = tpu.matmul %60, %61, %cst_23 {dimension_numbers = #tpu.dot_dimension_numbers<[1], [0], [0], [1], [0, 0, 1, 1], [], []>} : vector<8x32xf32>, vector<32x32xf32>, vector<8x32xf32> -> vector<8x32xf32>
    %c0_24 = arith.constant 0 : index
    %c0_25 = arith.constant 0 : index
    %63 = vector.load %arg7[%c0_24, %c0_25] : memref<1x32xf32, #tpu.memory_space<vmem>>, vector<1x32xf32>
    %64 = vector.shape_cast %63 : vector<1x32xf32> to vector<32xf32>
    %65 = vector.shape_cast %64 : vector<32xf32> to vector<1x32xf32>
    %66 = vector.broadcast %65 : vector<1x32xf32> to vector<8x32xf32>
    %67 = arith.addf %62, %66 : vector<8x32xf32>
    %68 = arith.addf %1, %67 : vector<8x32xf32>
    %c0_26 = arith.constant 0 : index
    %c0_27 = arith.constant 0 : index
    %c0_28 = arith.constant 0 : index
    %69 = vector.load %arg8[%c0_26, %c0_27, %c0_28] : memref<1x8x32xf32, #tpu.memory_space<vmem>>, vector<1x8x32xf32>
    %70 = vector.shape_cast %69 : vector<1x8x32xf32> to vector<8x32xf32>
    %71 = vector.shape_cast %68 : vector<8x32xf32> to vector<1x8x32xf32>
    tpu.vector_store %arg8[%c0_26, %c0_27, %c0_28], %71 {strides = array<i32>} : memref<1x8x32xf32, #tpu.memory_space<vmem>>, vector<1x8x32xf32>,
    return
  }
  func.func @transform_0(%arg0: i32) -> (i32, i32, i32) {
    %c0_i32 = arith.constant 0 : i32
    %c0_i32_0 = arith.constant 0 : i32
    %c0_i32_1 = arith.constant 0 : i32
    return %arg0, %c0_i32, %c0_i32_0 : i32, i32, i32
  }
  func.func @transform_1(%arg0: i32) -> (i32, i32) {
    %c0_i32 = arith.constant 0 : i32
    %c0_i32_0 = arith.constant 0 : i32
    %c0_i32_1 = arith.constant 0 : i32
    return %c0_i32, %c0_i32_0 : i32, i32
  }
  func.func @transform_2(%arg0: i32) -> (i32, i32) {
    %c0_i32 = arith.constant 0 : i32
    %c0_i32_0 = arith.constant 0 : i32
    %c0_i32_1 = arith.constant 0 : i32
    return %c0_i32, %c0_i32_0 : i32, i32
  }
  func.func @transform_3(%arg0: i32) -> (i32, i32) {
    %c0_i32 = arith.constant 0 : i32
    %c0_i32_0 = arith.constant 0 : i32
    %c0_i32_1 = arith.constant 0 : i32
    return %c0_i32, %c0_i32_0 : i32, i32
  }
  func.func @transform_4(%arg0: i32) -> (i32, i32) {
    %c0_i32 = arith.constant 0 : i32
    %c0_i32_0 = arith.constant 0 : i32
    %c0_i32_1 = arith.constant 0 : i32
    return %c0_i32, %c0_i32_0 : i32, i32
  }
  func.func @transform_5(%arg0: i32) -> (i32, i32) {
    %c0_i32 = arith.constant 0 : i32
    %c0_i32_0 = arith.constant 0 : i32
    %c0_i32_1 = arith.constant 0 : i32
    return %c0_i32, %c0_i32_0 : i32, i32
  }
  func.func @transform_6(%arg0: i32) -> (i32, i32) {
    %c0_i32 = arith.constant 0 : i32
    %c0_i32_0 = arith.constant 0 : i32
    %c0_i32_1 = arith.constant 0 : i32
    return %c0_i32, %c0_i32_0 : i32, i32
  }
  func.func @transform_7(%arg0: i32) -> (i32, i32, i32) {
    %c0_i32 = arith.constant 0 : i32
    %c0_i32_0 = arith.constant 0 : i32
    %c0_i32_1 = arith.constant 0 : i32
    return %arg0, %c0_i32, %c0_i32_0 : i32, i32, i32
  }
}

</mosaic_0001>

<bundles_post_ra>
// kernel: tpu_custom_call.1
= control target key start
LH: loop header
LB: loop body
LE: loop exit
PB: predicated region body
PF: predicated region fallthrough
CT: control target
= control target key end

     0   :  { %s2525_s0 = inlined_call_operand.hbm [shape: f32[2,8,32], index: 0, kind: input, shape index: {}]   ;;  %s2526_s1 = inlined_call_operand.vmem [shape: f32[1,32], index: 1, kind: input, shape index: {}]   ;;  %s2527_s2 = inlined_call_operand.vmem [shape: f32[1,32], index: 2, kind: input, shape index: {}]   ;;  %s2528_s3 = inlined_call_operand.hbm [shape: f32[32,96], index: 3, kind: input, shape index: {}]   ;;  %s2529_s4 = inlined_call_operand.vmem [shape: f32[1,96], index: 4, kind: input, shape index: {}]   ;;  %s2530_s5 = inlined_call_operand.hbm [shape: f32[32,32], index: 5, kind: input, shape index: {}]   ;;  %s2531_s6 = inlined_call_operand.vmem [shape: f32[1,32], index: 6, kind: input, shape index: {}]   ;;  %s2532_s7 = inlined_call_operand.hbm [shape: f32[2,8,32], index: 7, kind: output, shape index: {}]  }
   0x1   :  { %2537 = sst [smem:[#allocation12_spill]] %s2528_s3 }
   0x2   :  { %2538 = sst [smem:[#allocation13_spill]] %s2530_s5 }
   0x3   :  { %12 = vsyncpa [#allocation3], 0 }
   0x4   :  { %14 = vsyncpa [#allocation3 + $0x1], 0 }
   0x5   :  { %15 = vsyncpa [#allocation6], 0 }
   0x6   :  { %16 = vsyncpa [#allocation4], 0 }
   0x7   :  { %18 = vsyncpa [#allocation4 + $0x1], 0  ;;  %s2275_s24 = smov 0   ;;  %s2277_s25 = smov 0  }
   0x8   :  { %s2279_s26 = smov 0   ;;  %s2281_s27 = smov 0  }
   0x9 LB: > { %s2296_s28 = sadd.s32 4294967295, %s2215_s27   ;;  %s1844_s29 = sadd.s32 4294967294, %s2215_s27   ;;  %s2215_s27 = sphi %s2281_s27, %s2558_s27   ;;  %s2211_s26 = sphi %s2279_s26, %s2557_s26   ;;  %s2207_s25 = sphi %s2277_s25, %s2556_s25   ;;  %s2203_s24 = sphi %s2275_s24, %s2555_s24  }
   0xa   : > { %p44_p0 = scmp.ne.s32.totalorder %s2207_s25, %s2203_s24  ;;  %p2533_p1 = scmp.eq.s32.totalorder %s2296_s28, 0 }
   0xb   : > { %p200_p3 = scmp.eq.s32.totalorder %s1844_s29, 1  ;;  %p1845_p5 = scmp.ge.s32.totalorder %s2215_s27, 1 }
   0xc   : > { %p2305_p4 = por %p2533_p1, %p44_p0  ;;  %p207_p7 = scmp.lt.s32.totalorder %s2215_s27, 3 }
   0xd   : > { %p2310_p6 = por %p200_p3, %p44_p0  ;;  %s2217_s10 = smov [#allocation5]  }
   0xe   : > { %s2539_s30 = scalar_select %p2305_p4, 1, 0 }
   0xf   : > { %s2540_s8 = scalar_select %p2310_p6, 1, 0 }
  0x10   : > { %p2315_p8 = pnand %p1845_p5, %p207_p7  ;;  %s225_s11 = sshll.u32 %s2217_s10, 4  ;;  %s226_s11 = int_to_ptr.vmem [resolvable:$true] %s225_s11 }
  0x11   : > { %s2218_s13 = smov [#allocation7]   ;;  %s2078_s15 = scalar_lea.vmem %s226_s11, 512 }
  0x12   : > { %s2541_s9 = scalar_select %p2315_p8, 1, 0 }
  0x13   : > { %p1980_p9 = pneg %p2315_p8  ;;  %s241_s14 = sshll.u32 %s2218_s13, 4  ;;  %s242_s14 = int_to_ptr.vmem [resolvable:$true] %s241_s14 }
  0x14   : > { %p2079_p13 = scmp.ne.s32.totalorder %s226_s11, %s2078_s15  ;;  %p2086_p5 = scmp.lt.s32.totalorder %s226_s11, %s226_s11 }
  0x15   : > { %p2324_p11 = pnand %p1980_p9, %p2533_p1  ;;  %p2087_p7 = scmp.lt.s32.totalorder %s2078_s15, %s2078_s15 }
  0x17   : > { %p2069_p12 = pneg %p2324_p11  ;;  %p2088_p10 = por %p2087_p7, %p2086_p5 }
  0x19   : > { %p2081_p0 = pnand %p2079_p13, %p2069_p12 }
  0x1b   : > { %p2082_p3 = pneg %p2081_p0 }
  0x1d   : > { %p2089_p9 = pnand %p2088_p10, %p2082_p3 }
  0x1f   : > { %2092 = shalt.err (!%p2089_p9)
}
  0x20   : > { %s2219_s16 = smov 128   ;;  %s2220_s17 = smov 8  }
  0x21   : > { %s2543_s3 = sld [smem:[#allocation12_spill]]  ;;  %s2104_s20 = scalar_lea.vmem %s242_s14, 512 }
  0x22   : > { %p2105_p1 = scmp.ne.s32.totalorder %s242_s14, %s2104_s20  ;;  %p2112_p2 = scmp.lt.s32.totalorder %s242_s14, %s242_s14 }
  0x23   : > { %p2113_p6 = scmp.lt.s32.totalorder %s2104_s20, %s2104_s20 }
  0x24   : > { %p2107_p13 = pnand %p2105_p1, %p2069_p12 }
  0x25   : > { %p2114_p5 = por %p2113_p6, %p2112_p2 }
  0x26   : > { %p2108_p0 = pneg %p2107_p13 }
  0x27   : > { %1983 = dma.hbm_to_vmem [thread:$0]  (!%p2324_p11), %s2543_s3, 512, %s226_s11, [#allocation6], %s2219_s16, %s2219_s16, %s2220_s17  }
  0x28   : > { %p2115_p10 = pnand %p2114_p5, %p2108_p0 }
  0x2a   : > { %2118 = shalt.err (!%p2115_p10)
}
  0x2b   : > { %s2544_s5 = sld [smem:[#allocation13_spill]]  ;;  %s2347_s23 = sadd.s32 1, %s2215_s27  }
  0x2c   : > { %s31_s29 = sadd.s32 1, %s2211_s26  ;;  %s28_s10 = ssub.s32 %s2215_s27, %s2347_s23 }
  0x2d   : > { %p38_p1 = scmp.ne.s32.totalorder %s2211_s26, %s2207_s25  ;;  %p29_p2 = scmp.eq.s32.totalorder %s28_s10, 0 }
  0x2e   : > { %p39_p6 = scmp.eq.s32.totalorder %s2215_s27, 0  ;;  %p2545_p12 = scmp.eq.s32.totalorder %s2296_s28, 1 }
  0x2f   : > { %p1997_p7 = scmp.lt.s32.totalorder %s2215_s27, 2  ;;  %s258_s13 = sand.u32 1, %s2211_s26  }
  0x30   : > { %p2357_p3 = por %p2545_p12, %p38_p1  ;;  %p40_p9 = por %p39_p6, %p38_p1 }
  0x31   : > { %1986 = dma.hbm_to_vmem [thread:$0]  (!%p2324_p11), %s2544_s5, 512, %s242_s14, [#allocation6], %s2219_s16, %s2219_s16, %s2220_s17  }
  0x32   : > { %s2546_s11 = scalar_select %p2357_p3, 1, 0 }
  0x33   : > { %s2363_s12 = scalar_select %p29_p2, %s2211_s26, %s31_s29  }
  0x34   : > { %s1849_s15 = sshll.u32 %s258_s13, 3  ;;  %s1850_s14 = sshll.u32 %s2215_s27, 7 }
  0x35   : > { %s2370_s18 = scalar_lea.hbm %s2525_s0, %s1850_s14  ;;  %s262_s19 = scalar_lea.vmem [#allocation2], %s1849_s15 }
  0x36   : > { %s269_s20 = sshll.u32 %s262_s19, 4  ;;  %p2372_p11 = pnand %p1997_p7, %p40_p9  ;;  %s270_s20 = int_to_ptr.vmem [resolvable:$true] %s269_s20 }
  0x37   : > { %s259_s22 = scalar_lea.sflag [#allocation3], %s258_s13  ;;  %s2119_s29 = scalar_lea.hbm %s2370_s18, 128 }
  0x38   : > { %p2120_p13 = scmp.ne.s32.totalorder %s2370_s18, %s2119_s29  ;;  %p2121_p0 = pneg %p2372_p11 }
  0x39   : > { %s2124_s16 = scalar_lea.hbm %s2525_s0, 256  ;;  %p2125_p1 = scmp.lt.s32.totalorder %s2370_s18, %s2525_s0 }
  0x3a   : > { %p2122_p5 = pnand %p2121_p0, %p2120_p13  ;;  %p2126_p2 = scmp.lt.s32.totalorder %s2124_s16, %s2119_s29 }
  0x3c   : > { %p2123_p10 = pneg %p2122_p5  ;;  %p2127_p6 = por %p2126_p2, %p2125_p1 }
  0x3e   : > { %p2128_p12 = pnand %p2127_p6, %p2123_p10 }
  0x40   : > { %2131 = shalt.err (!%p2128_p12)
}
  0x41   : > { %s2132_s19 = scalar_lea.vmem %s270_s20, 128  ;;  %s2221_s13 = smov [#allocation2]  }
  0x42   : > { %p2133_p7 = scmp.ne.s32.totalorder %s270_s20, %s2132_s19  ;;  %s2137_s3 = sshll.u32 %s2221_s13, 4  ;;  %s2138_s3 = int_to_ptr.vmem [resolvable:$false] %s2137_s3 }
  0x43   : > { %s2139_s5 = scalar_lea.vmem %s2138_s3, 256  ;;  %p2140_p13 = scmp.lt.s32.totalorder %s270_s20, %s2138_s3 }
  0x44   : > { %p2135_p9 = pnand %p2133_p7, %p2121_p0  ;;  %p2141_p5 = scmp.lt.s32.totalorder %s2139_s5, %s2132_s19 }
  0x46   : > { %p2136_p3 = pneg %p2135_p9  ;;  %p2142_p4 = por %p2141_p5, %p2140_p13 }
  0x48   : > { %p2143_p8 = pnand %p2142_p4, %p2136_p3 }
  0x4a   : > { %2146 = shalt.err (!%p2143_p8)
}
  0x4b   : > { %1990 = dma.hbm_to_vmem [thread:$0]  (!%p2372_p11), %s2370_s18, 128, %s270_s20, %s259_s22  }
  0x4c   : > { %p2548_p10 = scmp.ne.s32.totalorder %s2541_s9, 0 }
  0x4d   : > { %s2393_s29 = sand.u32 (!%p2548_p10), 1, %s2207_s25   ;;  %p2549_p4 = scmp.ne.s32.totalorder (!%p2548_p10), %s2539_s30, 0 }
  0x4e   : > { %278 = sbr.rel (%p2548_p10) target bundleno = 2013 (0x7dd), region = 48  ;;  %s1852_s10 = sshll.u32 (!%p2548_p10), %s2393_s29, 3 }
  0x4f   : > { %s281_s3 = scalar_lea.sflag (!%p2548_p10), [#allocation3], %s2393_s29  ;;  %s284_s5 = scalar_lea.vmem (!%p2548_p10), [#allocation2], %s1852_s10 }
  0x53   : > { %2190 = dma.done.wait (%p2549_p4), %s281_s3, 128  }
  0x54   : > { %2192 = vsyncadd (%p2549_p4), %s281_s3, 4294967168  ;;  %p2550_p8 = scmp.eq.s32.totalorder %s2296_s28, 0 }
  0x56   : > { %2194 = dma.done.wait (%p2550_p8), [#allocation6], 1024   ;;  %p2551_p3 = pmov %p2550_p8 }
  0x57   : > { %vm326_vm0 = vcmask 261120   ;;  %v2407_v0 = vld [vmem:[%s284_s5] sm:$0xff]  ;;  %v2222_v5 = vmov 0.0   ;;  %vm2223_vm1 = vmmov 0   ;;  %v359_v7 = vld [vmem:[#allocation5 + $0x8] sm:$0xff]  ;;  %v358_v8 = vld [vmem:[#allocation5] sm:$0xff] }
  0x58   : > { %2196 = vsyncadd (%p2551_p3), [#allocation6], 4294966272  ;;  %v327_v1 = vsel %vm326_vm0, %v2407_v0, 0.0  ;;  %v332_v2 = vmul.f32 %v2407_v0, %v2407_v0  ;;  %v361_v4 = vld [vmem:[#allocation5 + $0x18] sm:$0xff]  ;;  %1906 = vmatprep.subr.mxu0 %v2222_v5  ;;  %v360_v6 = vld [vmem:[#allocation5 + $0x10] sm:$0xff]  ;;  %1914 = vmatprep.mubr.msk.f32.mxu0 %vm2223_vm1, %v2222_v5  ;;  %s2224_s14 = smov 104  }
  0x59   : > { %328 = vadd.xlane.f32.xlu0 %v327_v1  ;;  %1907 = vmatpush3.msra.mxu0 %v361_v4  ;;  %v1856_v19 = vld [vmem:[%s2526_s1] ss:$0 sm:$0xff]  ;;  %s2225_s16 = smov 120   ;;  %s2226_s17 = smov 112   ;;  %vm597_vm2 = vcmask 64512   ;;  %vm1651_vm3 = vcmask 130048  }
  0x5a   : > { %v333_v3 = vsel %vm326_vm0, %v332_v2, 0.0  ;;  %1922 = vmatprep.subr.mxu1 %v2222_v5  ;;  %1908 = vmatprep.subr.mxu0 %v2222_v5  ;;  %v1857_v21 = vld [vmem:[%s2527_s2] ss:$0 sm:$0xff]  ;;  %s2227_s15 = smov 96   ;;  %s2228_s19 = smov 64   ;;  %vm1653_vm4 = vcmask 195584  }
  0x5b   : > { %1924 = vmatprep.mubr.msk.f32.mxu1 %vm2223_vm1, %v2222_v5  ;;  %1909 = vmatpush3.msra.mxu0 %v360_v6  ;;  %v1858_v24 = vld [vmem:[%s2529_s4] ss:$0 sm:$0xff]  ;;  %s2231_s13 = smov 16   ;;  %s2232_s3 = smov 8  }
  0x5c   : > { %1910 = vmatprep.subr.mxu0 %v2222_v5  ;;  %s2233_s5 = smov 24   ;;  %s1877_s18 = sshll.u32 %s2296_s28, 7 }
  0x5d   : > { %334 = vadd.xlane.f32.xlu0 %v333_v3  ;;  %1911 = vmatpush3.msra.mxu0 %v359_v7  ;;  %s322_s20 = scalar_lea.vmem [#allocation8], %s1852_s10  ;;  %p2552_p0 = scmp.ne.s32.totalorder %s2546_s11, 0 }
  0x5e   : > { %1912 = vmatprep.subr.mxu0 %v2222_v5  ;;  %s1755_s21 = sshll.u32 %s322_s20, 4  ;;  %s2234_s28 = smov [#allocation8]   ;;  %s1756_s21 = int_to_ptr.vmem [resolvable:$true] %s1755_s21 }
  0x5f   : > { %1913 = vmatpush3.msra.mxu0 %v358_v8  ;;  %s2151_s10 = sshll.u32 %s2234_s28, 4  ;;  %s2152_s10 = int_to_ptr.vmem [resolvable:$false] %s2151_s10 }
  0x60   : > { %1917 = vmatprep.subr.mxu0 %v2222_v5  ;;  %p2154_p6 = scmp.lt.s32.totalorder %s1756_s21, %s2152_s10 }
  0xe2   : > { %v329_v9 = vpop.xlane.xlu0 %328 }
  0xe3   : > { %v331_v10 = vmul.f32 0.03125, %v329_v9 }
  0xe5   : > { %v337_v12 = vmul.f32 %v331_v10, %v331_v10  ;;  %v340_v17 = vsub.f32 %v2407_v0, %v331_v10 }
  0xe6   : > { %v335_v11 = vpop.xlane.xlu0 %334 }
  0xe7   : > { %v336_v13 = vmul.f32 0.03125, %v335_v11 }
  0xe9   : > { %v338_v14 = vsub.f32 %v336_v13, %v337_v12 }
  0xeb   : > { %v339_v15 = vmax.f32 %v338_v14, 0.0 }
  0xed   : > { %v341_v16 = vadd.f32 1e-05, %v339_v15 }
  0xef   : > { %2049 = vrsqrt.f32 %v341_v16 }
  0xfc   : > { %v2050_v18 = vpop.eup %2049 }
  0xfd   : > { %v343_v20 = vmul.f32 %v2050_v18, %v340_v17 }
  0xff   : > { %v350_v22 = vmul.f32 %v1856_v19, %v343_v20 }
 0x101   : > { %v357_v23 = vadd.f32 %v1857_v21, %v350_v22 }
 0x103   : > { %1915 = vmatmul.mubr.msk.f32.vlgmr.msra.gmra.mxu0 %vm326_vm0, %v357_v23 }
 0x104   : > { %1919 = vmatprep.mubr.msk.f32.mxu0 %vm2223_vm1, %v2222_v5 }
 0x1c3   : > { %v438_v25 = vpop.f32.mrf.mxu0 }
 0x1c4   : > { %v439_v26 = vadd.f32 %v1858_v24, %v438_v25 }
 0x1c5   : > { %v1916_v27 = vpop.f32.mrf.mxu0 }
 0x1c6   : > { %455 = vrot.lane.b32.xlu0 %v439_v26, %s2224_s14  ;;  %451 = vrot.lane.b32.xlu1 %v439_v26, %s2225_s16  ;;  %v442_v28 = vmul.f32 0.35355338, %v439_v26 }
 0x1ca   : > { %453 = vrot.lane.b32.xlu1 %v439_v26, %s2226_s17  ;;  %448 = vrot.lane.b32.xlu0 %v442_v28, %s2224_s14 }
 0x1ce   : > { %457 = vrot.lane.b32.xlu1 %v439_v26, %s2227_s15 }
 0x238   : > { %v452_v29 = vpop.permute.xlu1 %451  ;;  %v456_v31 = vpop.permute.xlu0 %455 }
 0x239   : > { %459 = vrot.lane.b32.xlu1 %v452_v29, %s2227_s15 }
 0x23c   : > { %v454_v30 = vpop.permute.xlu1 %453  ;;  %v449_v39 = vpop.permute.xlu0 %448 }
 0x23d   : > { %461 = vrot.lane.b32.xlu1 %v454_v30, %s2227_s15 }
 0x240   : > { %v458_v32 = vpop.permute.xlu1 %457 }
 0x241   : > { %463 = vrot.lane.b32.xlu1 %v456_v31, %s2227_s15  ;;  %s2147_s15 = scalar_lea.vmem %s1756_s21, 128 }
 0x242   : > { %p2148_p11 = scmp.ne.s32.totalorder %s1756_s21, %s2147_s15 }
 0x244   : > { %p2149_p1 = pnand %p2148_p11, %p2552_p0 }
 0x245   : > { %444 = vrot.lane.b32.xlu1 %v442_v28, %s2225_s16  ;;  %s1753_s16 = scalar_lea.hbm %s2532_s7, %s1877_s18 }
 0x246   : > { %p2150_p2 = pneg %p2149_p1 }
 0x249   : > { %446 = vrot.lane.b32.xlu1 %v442_v28, %s2226_s17  ;;  %s1742_s17 = scalar_lea.sflag [#allocation4], %s2393_s29 }
 0x272   : > { %469 = vxpose.xlu1.b32.start.end [1/1] (short) (narrow) %v458_v32, 8 }
 0x2ab   : > { %v460_v33 = vpop.permute.xlu1 %459 }
 0x2ac   : > { %501 = vxpose.xlu0.b32.start.end [1/1] (short) (narrow) %v460_v33, 8 }
 0x2af   : > { %v462_v34 = vpop.permute.xlu1 %461 }
 0x2b0   : > { %533 = vxpose.xlu0.b32.start.end [1/1] (short) (narrow) %v462_v34, 8 }
 0x2b3   : > { %v464_v35 = vpop.permute.xlu1 %463 }
 0x2b4   : > { %565 = vxpose.xlu0.b32.start.end [1/1] (short) (narrow) %v464_v35, 8 }
 0x2b7   : > { %v445_v36 = vpop.permute.xlu1 %444 }
 0x2bb   : > { %v447_v37 = vpop.permute.xlu1 %446 }
 0x2ee   : > { %v485_v38 = vpop.trf.xlu1 }
 0x2ef   : > { %1918 = vmatpush3.msra.mxu0 %v485_v38 }
 0x2f0   : > { %1920 = vmatmul.mubr.msk.f32.vlgmr.msra.gmra.mxu0 %vm597_vm2, %v442_v28  ;;  %1932 = vmatprep.subr.mxu0 %v2222_v5 }
 0x2f1   : > { %1934 = vmatprep.mubr.msk.f32.mxu0 %vm2223_vm1, %v2222_v5 }
 0x328   : > { %v517_v40 = vpop.trf.xlu0 }
 0x329   : > { %1923 = vmatpush3.msra.mxu1 %v517_v40 }
 0x32a   : > { %1925 = vmatmul.mubr.msk.f32.vlgmr.msra.gmra.mxu1 %vm597_vm2, %v445_v36  ;;  %1927 = vmatprep.subr.mxu1 %v2222_v5 }
 0x32b   : > { %1929 = vmatprep.mubr.msk.f32.mxu1 %vm2223_vm1, %v2222_v5 }
 0x32c   : > { %v549_v41 = vpop.trf.xlu0 }
 0x32d   : > { %1928 = vmatpush3.msra.mxu1 %v549_v41  ;;  %v1658_v41 = vld [vmem:[#allocation7 + $0x18] sm:$0xff] }
 0x32e   : > { %1930 = vmatmul.mubr.msk.f32.vlgmr.msra.gmra.mxu1 %vm597_vm2, %v447_v37  ;;  %1937 = vmatprep.subr.mxu1 %v2222_v5 }
 0x32f   : > { %1939 = vmatprep.mubr.msk.f32.mxu1 %vm2223_vm1, %v2222_v5 }
 0x330   : > { %v581_v42 = vpop.trf.xlu0 }
 0x331   : > { %1933 = vmatpush3.msra.mxu0 %v581_v42  ;;  %v2229_v42 = vmov 1983009808  }
 0x332   : > { %1935 = vmatmul.mubr.msk.f32.vlgmr.msra.gmra.mxu0 %vm597_vm2, %v449_v39  ;;  %1942 = vmatprep.subr.mxu0 %v2222_v5 }
 0x333   : > { %1944 = vmatprep.mubr.msk.f32.mxu0 %vm2223_vm1, %v2222_v5 }
 0x3b0   : > { %v666_v43 = vpop.f32.mrf.mxu0 }
 0x3b1   : > { %v886_v44 = vsel %vm597_vm2, %v666_v43, -inf }
 0x3b2   : > { %887 = vmax.xlane.f32.xlu0 %v886_v44  ;;  %v1921_v45 = vpop.f32.mrf.mxu0  ;;  %v1507_v44 = vlaneseq }
 0x3c8   : > { %930 = vrot.lane.b32.xlu0 %v439_v26, %s2228_s19 }
 0x3cc   : > { %934 = vrot.lane.b32.xlu0 %v454_v30, %s2228_s19 }
 0x3ea   : > { %v738_v46 = vpop.f32.mrf.mxu1 }
 0x3eb   : > { %v889_v47 = vsel %vm597_vm2, %v738_v46, -inf }
 0x3ec   : > { %890 = vmax.xlane.f32.xlu1 %v889_v47  ;;  %v1926_v48 = vpop.f32.mrf.mxu1  ;;  %v2230_v47 = vmov 1934713408  }
 0x3ed   : > { %v1537_v48 = vunpack.c.l.s4 %v2230_v47 }
 0x3ee   : > { %v810_v49 = vpop.f32.mrf.mxu1 }
 0x3ef   : > { %v892_v50 = vsel %vm597_vm2, %v810_v49, -inf }
 0x3f0   : > { %893 = vmax.xlane.f32.xlu1 %v892_v50  ;;  %v1931_v51 = vpop.f32.mrf.mxu1  ;;  %v1508_v50 = vshrl.u32 %v1507_v44, 7 }
 0x3f2   : > { %v882_v52 = vpop.f32.mrf.mxu0 }
 0x3f3   : > { %v895_v53 = vsel %vm597_vm2, %v882_v52, -inf }
 0x3f4   : > { %896 = vmax.xlane.f32.xlu1 %v895_v53  ;;  %v1936_v54 = vpop.f32.mrf.mxu0 }
 0x405   : > { %932 = vrot.lane.b32.xlu1 %v452_v29, %s2228_s19 }
 0x409   : > { %936 = vrot.lane.b32.xlu1 %v456_v31, %s2228_s19  ;;  %s2153_s19 = scalar_lea.vmem %s2152_s10, 256 }
 0x40a   : > { %p2155_p12 = scmp.lt.s32.totalorder %s2153_s19, %s2147_s15 }
 0x40c   : > { %p2156_p7 = por %p2155_p12, %p2154_p6 }
 0x40e   : > { %p2157_p9 = pnand %p2156_p7, %p2150_p2 }
 0x43b   : > { %v888_v55 = vpop.xlane.xlu0 %887 }
 0x43c   : > { %v898_v56 = vsub.f32 %v666_v43, %v888_v55  ;;  %v1505_v43 = vunpack.c.l.s4 %v2229_v42 }
 0x43e   : > { %v902_v57 = vmul.f32 1.442695, %v898_v56 }
 0x43f   : > { %v931_v13 = vpop.permute.xlu0 %930 }
 0x440   : > { %2051 = vpow2.f32 %v902_v57 }
 0x443   : > { %v935_v15 = vpop.permute.xlu0 %934 }
 0x44d   : > { %v2052_v58 = vpop.eup %2051 }
 0x44e   : > { %v910_v59 = vsel %vm597_vm2, %v2052_v58, 0.0 }
 0x44f   : > { %911 = vadd.xlane.f32.xlu1 %v910_v59 }
 0x475   : > { %v891_v60 = vpop.xlane.xlu1 %890 }
 0x476   : > { %v899_v61 = vsub.f32 %v738_v46, %v891_v60 }
 0x478   : > { %v904_v62 = vmul.f32 1.442695, %v899_v61 }
 0x479   : > { %v894_v63 = vpop.xlane.xlu1 %893 }
 0x47a   : > { %2053 = vpow2.f32 %v904_v62  ;;  %v900_v1 = vsub.f32 %v810_v49, %v894_v63  ;;  %v1506_v49 = vunpack.c.0.s8 %v1505_v43 }
 0x47c   : > { %v906_v2 = vmul.f32 1.442695, %v900_v1  ;;  %v1509_v53 = vsub.s32 %v1506_v49, %v1508_v50 }
 0x47d   : > { %v897_v3 = vpop.xlane.xlu1 %896 }
 0x47e   : > { %2055 = vpow2.f32 %v906_v2  ;;  %v901_v4 = vsub.f32 %v882_v52, %v897_v3  ;;  %v1538_v52 = vunpack.c.0.s8 %v1537_v48 }
 0x480   : > { %v908_v6 = vmul.f32 1.442695, %v901_v4  ;;  %v1541_v59 = vsub.s32 %v1538_v52, %v1508_v50 }
 0x481   : > { %v933_v14 = vpop.permute.xlu1 %932 }
 0x482   : > { %2057 = vpow2.f32 %v908_v6  ;;  %v1657_v6 = vld [vmem:[#allocation7 + $0x10] sm:$0xff] }
 0x485   : > { %v937_v16 = vpop.permute.xlu1 %936 }
 0x487   : > { %v2054_v7 = vpop.eup %2053 }
 0x488   : > { %v913_v8 = vsel %vm597_vm2, %v2054_v7, 0.0 }
 0x489   : > { %914 = vadd.xlane.f32.xlu0 %v913_v8 }
 0x48b   : > { %v2056_v9 = vpop.eup %2055 }
 0x48c   : > { %v916_v10 = vsel %vm597_vm2, %v2056_v9, 0.0 }
 0x48d   : > { %917 = vadd.xlane.f32.xlu1 %v916_v10 }
 0x48f   : > { %v2058_v11 = vpop.eup %2057 }
 0x490   : > { %v919_v12 = vsel %vm597_vm2, %v2058_v11, 0.0 }
 0x491   : > { %920 = vadd.xlane.f32.xlu0 %v919_v12 }
 0x4be   : > { %942 = vxpose.xlu0.b32.start.end [1/1] (short) (narrow) %v931_v13, 8 }
 0x4c0   : > { %974 = vxpose.xlu1.b32.start.end [1/1] (short) (narrow) %v933_v14, 8 }
 0x4c2   : > { %1006 = vxpose.xlu0.b32.start.end [1/1] (short) (narrow) %v935_v15, 8 }
 0x4c6   : > { %1038 = vxpose.xlu0.b32.start.end [1/1] (short) (narrow) %v937_v16, 8  ;;  %v1655_v16 = vld [vmem:[#allocation7] sm:$0xff] }
 0x4d8   : > { %v912_v17 = vpop.xlane.xlu1 %911 }
 0x4d9   : > { %2059 = vrcp.f32 %v912_v17 }
 0x4e6   : > { %v2060_v18 = vpop.eup %2059 }
 0x4e7   : > { %v926_v19 = vmul.f32 %v2060_v18, %v2052_v58 }
 0x4e9   : > { %1938 = vmatpush3.xpose.msk.msra.mxu1 %vm597_vm2, %v926_v19 }
 0x4ea   : > { %1947 = vmatprep.subr.mxu1 %v2222_v5 }
 0x512   : > { %v915_v20 = vpop.xlane.xlu0 %914 }
 0x513   : > { %2061 = vrcp.f32 %v915_v20 }
 0x516   : > { %v918_v23 = vpop.xlane.xlu1 %917 }
 0x517   : > { %2063 = vrcp.f32 %v918_v23 }
 0x51a   : > { %v921_v24 = vpop.xlane.xlu0 %920 }
 0x51b   : > { %2065 = vrcp.f32 %v921_v24 }
 0x520   : > { %v2062_v21 = vpop.eup %2061 }
 0x521   : > { %v927_v22 = vmul.f32 %v2062_v21, %v2054_v7  ;;  %v1656_v7 = vld [vmem:[#allocation7 + $0x8] sm:$0xff] }
 0x523   : > { %1943 = vmatpush3.xpose.msk.msra.mxu0 %vm597_vm2, %v927_v22 }
 0x524   : > { %1952 = vmatprep.subr.mxu0 %v2222_v5  ;;  %v2064_v25 = vpop.eup %2063 }
 0x525   : > { %v928_v28 = vmul.f32 %v2064_v25, %v2056_v9 }
 0x528   : > { %v2066_v26 = vpop.eup %2065 }
 0x529   : > { %v929_v30 = vmul.f32 %v2066_v26, %v2058_v11 }
 0x53a   : > { %v958_v27 = vpop.trf.xlu0 }
 0x53b   : > { %1940 = vmatmul.mubr.msk.f32.vlgmr.msra.gmra.mxu1 %vm597_vm2, %v958_v27 }
 0x53c   : > { %1948 = vmatpush3.xpose.msk.msra.mxu1 %vm597_vm2, %v928_v28  ;;  %v990_v29 = vpop.trf.xlu1  ;;  %1949 = vmatprep.mubr.msk.f32.mxu1 %vm2223_vm1, %v2222_v5 }
 0x53d   : > { %1945 = vmatmul.mubr.msk.f32.vlgmr.msra.gmra.mxu0 %vm597_vm2, %v990_v29  ;;  %1957 = vmatprep.subr.mxu1 %v2222_v5 }
 0x53e   : > { %1953 = vmatpush3.xpose.msk.msra.mxu0 %vm597_vm2, %v929_v30  ;;  %v1022_v31 = vpop.trf.xlu0  ;;  %1954 = vmatprep.mubr.msk.f32.mxu0 %vm2223_vm1, %v2222_v5 }
 0x53f   : > { %1950 = vmatmul.mubr.msk.f32.vlgmr.msra.gmra.mxu1 %vm597_vm2, %v1022_v31 }
 0x540   : > { %1965 = vmatprep.mubr.msk.f32.mxu1 %vm2223_vm1, %v2222_v5  ;;  %1958 = vmatpush3.msra.mxu1 %v1658_v41 }
 0x541   : > { %1959 = vmatprep.subr.mxu1 %v2222_v5 }
 0x542   : > { %v1054_v32 = vpop.trf.xlu0  ;;  %1960 = vmatpush3.msra.mxu1 %v1657_v6 }
 0x543   : > { %1955 = vmatmul.mubr.msk.f32.vlgmr.msra.gmra.mxu0 %vm597_vm2, %v1054_v32  ;;  %1961 = vmatprep.subr.mxu1 %v2222_v5 }
 0x544   : > { %1962 = vmatpush3.msra.mxu1 %v1656_v7 }
 0x545   : > { %1963 = vmatprep.subr.mxu1 %v2222_v5 }
 0x546   : > { %1964 = vmatpush3.msra.mxu1 %v1655_v16 }
 0x5fb   : > { %v1142_v33 = vpop.f32.mrf.mxu1 }
 0x5fc   : > { %1374 = vxpose.xlu0.b32.start.end [1/1] (short) (narrow) %v1142_v33, 8 }
 0x5fd   : > { %v1941_v34 = vpop.f32.mrf.mxu1  ;;  %v1218_v35 = vpop.f32.mrf.mxu0 }
 0x5fe   : > { %1406 = vxpose.xlu1.b32.start.end [1/1] (short) (narrow) %v1218_v35, 8 }
 0x5ff   : > { %v1294_v36 = vpop.f32.mrf.mxu1  ;;  %v1946_v37 = vpop.f32.mrf.mxu0 }
 0x600   : > { %1438 = vxpose.xlu0.b32.start.end [1/1] (short) (narrow) %v1294_v36, 8 }
 0x601   : > { %v1951_v38 = vpop.f32.mrf.mxu1 }
 0x602   : > { %v1874_v38 = vld [vmem:[%s2531_s6] ss:$0 sm:$0xff] }
 0x603   : > { %v1370_v39 = vpop.f32.mrf.mxu0 }
 0x604   : > { %1470 = vxpose.xlu1.b32.start.end [1/1] (short) (narrow) %v1370_v39, 8 }
 0x605   : > { %v1956_v40 = vpop.f32.mrf.mxu0 }
 0x678   : > { %v1390_v45 = vpop.trf.xlu0 }
 0x67a   : > { %v1422_v46 = vpop.trf.xlu1 }
 0x67c   : > { %v1454_v51 = vpop.trf.xlu0 }
 0x67d   : > { %v1502_v54 = vcombine.low %v1390_v45, %v1454_v51  ;;  %v1503_v55 = vcombine.high %v1390_v45, %v1454_v51 }
 0x67f   : > { %v1510_v60 = vrot.slane %v1502_v54, %v1509_v53  ;;  %v1517_v61 = vrot.slane %v1503_v55, %v1509_v53 }
 0x680   : > { %v1486_v56 = vpop.trf.xlu1 }
 0x681   : > { %v1518_v57 = vcombine.low %v1422_v46, %v1486_v56  ;;  %v1519_v58 = vcombine.high %v1422_v46, %v1486_v56 }
 0x683   : > { %v1526_v62 = vrot.slane %v1518_v57, %v1509_v53  ;;  %v1533_v63 = vrot.slane %v1519_v58, %v1509_v53 }
 0x685   : > { %v1534_v1 = vcombine.low %v1510_v60, %v1526_v62  ;;  %v1535_v2 = vcombine.high %v1510_v60, %v1526_v62  ;;  %v1550_v3 = vcombine.low %v1517_v61, %v1533_v63  ;;  %v1551_v4 = vcombine.high %v1517_v61, %v1533_v63 }
 0x687   : > { %v1542_v8 = vrot.slane %v1534_v1, %v1541_v59  ;;  %v1549_v9 = vrot.slane %v1535_v2, %v1541_v59  ;;  %v1558_v10 = vrot.slane %v1550_v3, %v1541_v59  ;;  %v1565_v11 = vrot.slane %v1551_v4, %v1541_v59 }
 0x689   : > { %v1570_v12 = vcombine.low %v1542_v8, %v1549_v9  ;;  %v1872_v13 = vcombine.high %v1542_v8, %v1549_v9  ;;  %v1586_v14 = vcombine.low %v1558_v10, %v1565_v11  ;;  %v1873_v15 = vcombine.high %v1558_v10, %v1565_v11 }
 0x68b   : > { %v1577_v17 = vrot.slane %v1570_v12, %v1509_v53  ;;  %v1585_v18 = vrot.slane %v1872_v13, %v1509_v53  ;;  %v1593_v19 = vrot.slane %v1586_v14, %v1509_v53  ;;  %v1601_v20 = vrot.slane %v1873_v15, %v1509_v53 }
 0x68d   : > { %v1603_v21 = vcombine.high %v1577_v17, %v1585_v18  ;;  %v1619_v22 = vcombine.high %v1593_v19, %v1601_v20  ;;  %v1602_v23 = vcombine.low %v1577_v17, %v1585_v18  ;;  %v1618_v24 = vcombine.low %v1593_v19, %v1601_v20 }
 0x68f   : > { %v1617_v25 = vrot.slane %v1603_v21, %v1541_v59  ;;  %v1633_v26 = vrot.slane %v1619_v22, %v1541_v59  ;;  %v1610_v27 = vrot.slane %v1602_v23, %v1541_v59  ;;  %v1626_v28 = vrot.slane %v1618_v24, %v1541_v59 }
 0x691   : > { %v1636_v29 = vcombine.low %v1617_v25, %v1633_v26  ;;  %v1635_v30 = vcombine.high %v1610_v27, %v1626_v28  ;;  %v1634_v31 = vcombine.low %v1610_v27, %v1626_v28  ;;  %v1637_v5 = vcombine.high %v1617_v25, %v1633_v26 }
 0x693   : > { %1643 = vrot.lane.b32.xlu1 %v1636_v29, %s2231_s13  ;;  %1639 = vrot.lane.b32.xlu0 %v1635_v30, %s2232_s3 }
 0x697   : > { %1647 = vrot.lane.b32.xlu1 %v1637_v5, %s2233_s5 }
 0x705   : > { %v1644_v32 = vpop.permute.xlu1 %1643  ;;  %v1640_v33 = vpop.permute.xlu0 %1639 }
 0x706   : > { %v1650_v34 = vsel %vm597_vm2, %v1634_v31, %v1640_v33 }
 0x707   : > { %v1652_v36 = vsel %vm1651_vm3, %v1650_v34, %v1644_v32 }
 0x709   : > { %v1648_v35 = vpop.permute.xlu1 %1647 }
 0x70a   : > { %v1654_v37 = vsel %vm1653_vm4, %v1652_v36, %v1648_v35 }
 0x70b   : > { %1966 = vmatmul.mubr.msk.f32.vlgmr.msra.gmra.mxu1 %vm326_vm0, %v1654_v37 }
 0x7cb   : > { %v1735_v39 = vpop.f32.mrf.mxu1 }
 0x7cc   : > { %v1736_v40 = vadd.f32 %v1874_v38, %v1735_v39 }
 0x7cd   : > { %v1967_v41 = vpop.f32.mrf.mxu1 }
 0x7ce   : > { %v1739_v42 = vadd.f32 %v1736_v40, %v2407_v0 }
 0x7d0   : > { %1740 = vst.msk [vmem:[%s322_s20] sm:$0xff] %vm326_vm0, %v1739_v42 }
 0x7d1   : > { %2160 = shalt.err (!%p2157_p9)
}
 0x7d2   : > { %s2161_s13 = scalar_lea.hbm %s1753_s16, 128  ;;  %s2165_s5 = scalar_lea.hbm %s2532_s7, 256 }
 0x7d3   : > { %p2162_p13 = scmp.ne.s32.totalorder %s1753_s16, %s2161_s13  ;;  %p2166_p4 = scmp.lt.s32.totalorder %s1753_s16, %s2532_s7 }
 0x7d4   : > { %p2167_p8 = scmp.lt.s32.totalorder %s2165_s5, %s2161_s13 }
 0x7d5   : > { %p2163_p5 = pnand %p2162_p13, %p2552_p0 }
 0x7d6   : > { %p2168_p3 = por %p2167_p8, %p2166_p4 }
 0x7d7   : > { %p2164_p10 = pneg %p2163_p5 }
 0x7d9   : > { %p2169_p11 = pnand %p2168_p3, %p2164_p10 }
 0x7db   : > { %2172 = shalt.err (!%p2169_p11)
}
 0x7dc   : > { %1978 = dma.vmem_to_hbm [thread:$0]  (%p2552_p0), %s1756_s21, 128, %s1753_s16, %s1742_s17  }
 0x7dd PF: > { %s1767_s18 = sand.u32 1, %s2203_s24   ;;  %p2553_p1 = scmp.ne.s32.totalorder %s2540_s8, 0 }
 0x7de   : > { %p2554_p2 = scmp.ge.s32.totalorder %s2215_s27, 2  ;;  %s1768_s20 = scalar_lea.sflag [#allocation4], %s1767_s18 }
 0x7e0   : > { %p1992_p6 = pnand %p2554_p2, %p2553_p1 }
 0x7e2   : > { %p1993_p12 = pneg %p1992_p6 }
 0x7e4   : > { %2198 = dma.done.wait (%p1993_p12), %s1768_s20, 128  }
 0x7e5   : > { %2200 = vsyncadd (%p1993_p12), %s1768_s20, 4294967168  ;;  %p21_p7 = scmp.ge.s32.totalorder %s2347_s23, 4   ;;  %s2555_s24 = smov %s2207_s25 }
 0x7e6   : > { %s2556_s25 = smov %s2211_s26  ;;  %s2557_s26 = smov %s2363_s12 }
 0x7e7   : > { %s2558_s27 = smov %s2347_s23  ;;  %23 = sbr.rel (!%p21_p7) target bundleno = 9 (0x9), region = 101 }
 0x7ec   :  { %1773 = vsyncpa [#allocation3], 1 }
 0x7ed   :  { %1775 = vsyncpa [#allocation3 + $0x1], 1 }
 0x7ee   :  { %1776 = vsyncpa [#allocation6], 1 }
 0x7ef   :  { %1777 = vsyncpa [#allocation4], 1 }
 0x7f0   :  { %1779 = vsyncpa [#allocation4 + $0x1], 1 }

</bundles_post_ra>
